<compile_context>
chip_gen: v5e
topology: v5e:2x2
jax: 0.10.0
libtpu: 0.0.40
codegen_flags: <defaults>
</compile_context>

<pallas_src>
import jax
import jax.numpy as jnp
from jax.experimental import pallas as pl
from jax.experimental.pallas import tpu as pltpu

_HIDDEN = 64       # fixed by the module: nn.Linear(input_size, 64)
_LANE = 128        # TPU lane width; hidden dim padded to this for lane-dense fc1
_MAX_BLOCK_B = 2048
_SMALL_B = 512     # batches at or below this use the grid-less single-block path


def _round_up(x, m):
    return (x + m - 1) // m * m


def _policy_net_kernel(x_ref, w1_ref, b1_ref, w2_ref, b2_ref, out_ref):
    # In-kernel f32 -> bf16 cast (cheap VPU work hidden under the input DMA).
    x = x_ref[...].astype(jnp.bfloat16)
    # fc1 on the MXU: bf16 inputs, f32 accumulation; hidden padded to 128 lanes.
    h = jnp.dot(x, w1_ref[...], preferred_element_type=jnp.float32)
    # Bias + ReLU on the VPU in f32 (lane-dense: hidden padded to 128).
    h = jnp.maximum(h + b1_ref[...], 0.0)
    # fc2 on the MXU; narrow (tile_B, num_actions) result.
    o = jnp.dot(h.astype(jnp.bfloat16), w2_ref[...],
                preferred_element_type=jnp.float32)
    out_ref[...] = (o + b2_ref[...]).astype(out_ref.dtype)


def prepare_params(w1, b1, w2, b2):
    """One-time prep: pad hidden dim to 128 lanes, cast matmul weights to bf16.

    Hoisted out of the per-call forward path so the pad/scatter/cast XLA ops
    are paid once, not per inference call.
    """
    In, H = w1.shape
    A = w2.shape[1]
    HP = _round_up(H, _LANE)
    w1p = jnp.zeros((In, HP), jnp.bfloat16).at[:, :H].set(w1.astype(jnp.bfloat16))
    b1p = jnp.zeros((1, HP), jnp.float32).at[:, :H].set(b1.astype(jnp.float32))
    w2p = jnp.zeros((HP, A), jnp.bfloat16).at[:H, :].set(w2.astype(jnp.bfloat16))
    b2p = b2.astype(jnp.float32).reshape(1, A)
    return w1p, b1p, w2p, b2p


@jax.jit
def policy_net_forward(state, w1p, b1p, w2p, b2p):
    """state: (B, In) f32; params from prepare_params(). Returns (B, A) f32 logits."""
    B, In = state.shape
    HP = w1p.shape[1]
    A = w2p.shape[1]

    if B <= _SMALL_B:
        # Small batch (typical RL rollout): single block, no grid -> no
        # pipeline bookkeeping; whole problem resident in VMEM; no slicing.
        return pl.pallas_call(
            _policy_net_kernel,
            out_shape=jax.ShapeDtypeStruct((B, A), jnp.float32),
            in_specs=[pl.BlockSpec(memory_space=pltpu.MemorySpace.VMEM)] * 5,
            out_specs=pl.BlockSpec(memory_space=pltpu.MemorySpace.VMEM),
        )(state, w1p, b1p, w2p, b2p)

    # Large batch: tile the batch axis.  block_b chosen so the grid always has
    # >= 2 steps (both v7x TensorCores get work on the "parallel" axis) while
    # staying large (<= 2048 rows) to amortize per-step overhead.
    block_b = min(_MAX_BLOCK_B, _round_up(pl.cdiv(B, 2), 256))
    grid = (pl.cdiv(B, block_b),)  # no batch pad: OOB rows of the last partial
                                   # block never reach valid output.
    return pl.pallas_call(
        _policy_net_kernel,
        out_shape=jax.ShapeDtypeStruct((B, A), jnp.float32),
        grid=grid,
        in_specs=[
            pl.BlockSpec((block_b, In), lambda i: (i, 0)),
            # Constant block indices: Pallas keeps these resident in VMEM
            # across grid steps (no per-step re-DMA).
            pl.BlockSpec((In, HP), lambda i: (0, 0)),
            pl.BlockSpec((1, HP), lambda i: (0, 0)),
            pl.BlockSpec((HP, A), lambda i: (0, 0)),
            pl.BlockSpec((1, A), lambda i: (0, 0)),
        ],
        out_specs=pl.BlockSpec((block_b, A), lambda i: (i, 0)),
        compiler_params=pltpu.CompilerParams(
            dimension_semantics=("parallel",)),
    )(state, w1p, b1p, w2p, b2p)


def init_params(key, input_size, hidden, num_actions):
    """Deterministic init mimicking nn.Linear's uniform(-1/sqrt(fan_in), ...)."""
    k1, k2, k3, k4 = jax.random.split(key, 4)
    bound1 = 1.0 / jnp.sqrt(jnp.float32(input_size))
    bound2 = 1.0 / jnp.sqrt(jnp.float32(hidden))
    w1 = jax.random.uniform(k1, (input_size, hidden), jnp.float32, -bound1, bound1)
    b1 = jax.random.uniform(k2, (hidden,), jnp.float32, -bound1, bound1)
    w2 = jax.random.uniform(k3, (hidden, num_actions), jnp.float32, -bound2, bound2)
    b2 = jax.random.uniform(k4, (num_actions,), jnp.float32, -bound2, bound2)
    return w1, b1, w2, b2


def policy_net_ref(state, w1, b1, w2, b2):
    """Pure-JAX reference matching the kernel math (bf16 matmuls, f32 acc)."""
    h = jnp.dot(state.astype(jnp.bfloat16), w1.astype(jnp.bfloat16),
                preferred_element_type=jnp.float32) + b1
    h = jnp.maximum(h, 0.0)
    return jnp.dot(h.astype(jnp.bfloat16), w2.astype(jnp.bfloat16),
                   preferred_element_type=jnp.float32) + b2


if __name__ == "__main__":
    input_size = 16
    hidden = _HIDDEN
    num_actions = 4

    key = jax.random.PRNGKey(0)
    k_state, k_params, k_big = jax.random.split(key, 3)
    w1, b1, w2, b2 = init_params(k_params, input_size, hidden, num_actions)

    # One-time weight prep (padding + bf16 cast), hoisted off the call path.
    w1p, b1p, w2p, b2p = prepare_params(w1, b1, w2, b2)

    # --- Small-batch path (grid-less, everything resident in VMEM) ---
    batch = 2
    state = jax.random.normal(k_state, (batch, input_size), jnp.float32)
    out = jax.block_until_ready(policy_net_forward(state, w1p, b1p, w2p, b2p))
    assert out.shape == (batch, num_actions)

    ref = policy_net_ref(state, w1, b1, w2, b2)
    assert jnp.allclose(out, ref, atol=2e-3, rtol=2e-3), "mismatch vs bf16 reference"

    ref_f32 = jnp.maximum(state @ w1 + b1, 0.0) @ w2 + b2
    assert jnp.allclose(out, ref_f32, atol=1e-1, rtol=1e-1), "mismatch vs f32 reference"

    # --- Batched path (grid over batch, partial last block, 'parallel' axis) ---
    big_batch = 600  # not a multiple of block_b -> exercises the partial block
    state_big = jax.random.normal(k_big, (big_batch, input_size), jnp.float32)
    out_big = jax.block_until_ready(
        policy_net_forward(state_big, w1p, b1p, w2p, b2p))
    assert out_big.shape == (big_batch, num_actions)
    ref_big = policy_net_ref(state_big, w1, b1, w2, b2)
    assert jnp.allclose(out_big, ref_big, atol=2e-3, rtol=2e-3), "batched mismatch"

    print("KERNEL_OK")
</pallas_src>

<mosaic_0001>
module attributes {stable_mosaic.version = 11 : i64} {
  func.func @_policy_net_kernel(%arg0: memref<2x16xf32, #tpu.memory_space<vmem>>, %arg1: memref<16x128xbf16, #tpu.memory_space<vmem>>, %arg2: memref<1x128xf32, #tpu.memory_space<vmem>>, %arg3: memref<128x4xbf16, #tpu.memory_space<vmem>>, %arg4: memref<1x4xf32, #tpu.memory_space<vmem>>, %arg5: memref<2x4xf32, #tpu.memory_space<vmem>>) attributes {dimension_semantics = [], scalar_prefetch = 0 : i64, scratch_operands = 0 : i64, tpu.core_type = #tpu.core_type<tc>} {
    %c0 = arith.constant 0 : index
    %c0_0 = arith.constant 0 : index
    %0 = vector.load %arg0[%c0, %c0_0] : memref<2x16xf32, #tpu.memory_space<vmem>>, vector<2x16xf32>
    %1 = arith.truncf %0 : vector<2x16xf32> to vector<2x16xbf16>
    %c0_1 = arith.constant 0 : index
    %c0_2 = arith.constant 0 : index
    %2 = vector.load %arg1[%c0_1, %c0_2] : memref<16x128xbf16, #tpu.memory_space<vmem>>, vector<16x128xbf16>
    %cst = arith.constant dense<0.000000e+00> : vector<2x128xf32>
    %3 = tpu.matmul %1, %2, %cst {dimension_numbers = #tpu.dot_dimension_numbers<[1], [0], [0], [1], [0, 0, 1, 1], [], []>} : vector<2x16xbf16>, vector<16x128xbf16>, vector<2x128xf32> -> vector<2x128xf32>
    %c0_3 = arith.constant 0 : index
    %c0_4 = arith.constant 0 : index
    %4 = vector.load %arg2[%c0_3, %c0_4] : memref<1x128xf32, #tpu.memory_space<vmem>>, vector<1x128xf32>
    %5 = vector.broadcast %4 : vector<1x128xf32> to vector<2x128xf32>
    %6 = arith.addf %3, %5 : vector<2x128xf32>
    %cst_5 = arith.constant 0.000000e+00 : f32
    %7 = vector.broadcast %cst_5 : f32 to vector<2x128xf32>
    %8 = arith.maximumf %6, %7 : vector<2x128xf32>
    %9 = arith.truncf %8 : vector<2x128xf32> to vector<2x128xbf16>
    %c0_6 = arith.constant 0 : index
    %c0_7 = arith.constant 0 : index
    %10 = vector.load %arg3[%c0_6, %c0_7] : memref<128x4xbf16, #tpu.memory_space<vmem>>, vector<128x4xbf16>
    %cst_8 = arith.constant dense<0.000000e+00> : vector<2x4xf32>
    %11 = tpu.matmul %9, %10, %cst_8 {dimension_numbers = #tpu.dot_dimension_numbers<[1], [0], [0], [1], [0, 0, 1, 1], [], []>} : vector<2x128xbf16>, vector<128x4xbf16>, vector<2x4xf32> -> vector<2x4xf32>
    %c0_9 = arith.constant 0 : index
    %c0_10 = arith.constant 0 : index
    %12 = vector.load %arg4[%c0_9, %c0_10] : memref<1x4xf32, #tpu.memory_space<vmem>>, vector<1x4xf32>
    %13 = vector.broadcast %12 : vector<1x4xf32> to vector<2x4xf32>
    %14 = arith.addf %11, %13 : vector<2x4xf32>
    %c0_11 = arith.constant 0 : index
    %c0_12 = arith.constant 0 : index
    %15 = vector.load %arg5[%c0_11, %c0_12] : memref<2x4xf32, #tpu.memory_space<vmem>>, vector<2x4xf32>
    tpu.vector_store %arg5[%c0_11, %c0_12], %14 {strides = array<i32>} : memref<2x4xf32, #tpu.memory_space<vmem>>, vector<2x4xf32>,
    return
  }
}

</mosaic_0001>

<bundles_post_ra>
// kernel: policy_net_forward.1
= control target key start
LH: loop header
LB: loop body
LE: loop exit
PB: predicated region body
PF: predicated region fallthrough
CT: control target
= control target key end

     0   :  { %vm36_vm0 = vcmask 130048   ;;  %s299_s0 = inlined_call_operand.vmem [shape: f32[2,16], index: 0, kind: input, shape index: {}]   ;;  %s300_s1 = inlined_call_operand.vmem [shape: bf16[16,128], index: 1, kind: input, shape index: {}]   ;;  %s301_s2 = inlined_call_operand.vmem [shape: f32[1,128], index: 2, kind: input, shape index: {}]   ;;  %s302_s3 = inlined_call_operand.vmem [shape: bf16[128,4], index: 3, kind: input, shape index: {}]   ;;  %s303_s4 = inlined_call_operand.vmem [shape: f32[1,4], index: 4, kind: input, shape index: {}]   ;;  %s304_s5 = inlined_call_operand.hbm [shape: f32[2,4], index: 5, kind: output, shape index: {}]  }
   0x1   :  { %v191_v0 = vld [vmem:[%s300_s1] sm:$0xff]  ;;  %v199_v2 = vld [vmem:[%s302_s3 + $0x38] sm:$0xff]  ;;  %v198_v4 = vld [vmem:[%s302_s3 + $0x30] sm:$0xff] }
   0x2   :  { %v22_v1 = vld [vmem:[%s299_s0] sm:$0x3]  ;;  %47 = vmatpush.bf16.msra.mxu0 %v191_v0  ;;  %123 = vmatpush.bf16.msra.mxu1 %v199_v2 }
   0x3   :  { %v23_v3 = vpack.c.bf16 %v22_v1, %v22_v1 }
   0x4   :  { %10 = vsyncpa [#allocation3], 0  ;;  %v197_v5 = vld [vmem:[%s302_s3 + $0x28] sm:$0xff]  ;;  %v196_v6 = vld [vmem:[%s302_s3 + $0x20] sm:$0xff]  ;;  %s229_s15 = smov [#allocation2]   ;;  %vm136_vm1 = vcmask 25600  }
   0x5   :  { %158 = vmatmul.msk.bf16.vlgmr.msra.gmra.mxu0 %vm36_vm0, %v23_v3  ;;  %v195_v7 = vld [vmem:[%s302_s3 + $0x18] sm:$0xff]  ;;  %v194_v8 = vld [vmem:[%s302_s3 + $0x10] sm:$0xff]  ;;  %v193_v9 = vld [vmem:[%s302_s3 + $0x8] sm:$0xff]  ;;  %s143_s16 = sshll.u32 %s229_s15, 4  ;;  %s144_s16 = int_to_ptr.vmem [resolvable:$true] %s143_s16 }
   0x6   :  { %124 = vmatpush.bf16.msra.mxu1 %v198_v4  ;;  %v192_v10 = vld [vmem:[%s302_s3] sm:$0xff]  ;;  %s145_s3 = sshll.u32 %s304_s5, 4  ;;  %s146_s3 = int_to_ptr.hbm [resolvable:$true] %s145_s3 }
   0x7   :  { %v201_v11 = vld [vmem:[%s301_s2] ss:$0 sm:$0xff] }
   0x8   :  { %v202_v17 = vld [vmem:[%s303_s4] ss:$0 sm:$0xff] }
   0xa   :  { %125 = vmatpush.bf16.msra.mxu1 %v197_v5 }
   0xe   :  { %126 = vmatpush.bf16.msra.mxu1 %v196_v6 }
  0x12   :  { %127 = vmatpush.bf16.msra.mxu1 %v195_v7 }
  0x16   :  { %128 = vmatpush.bf16.msra.mxu1 %v194_v8 }
  0x1a   :  { %129 = vmatpush.bf16.msra.mxu1 %v193_v9 }
  0x1e   :  { %130 = vmatpush.bf16.msra.mxu1 %v192_v10 }
  0x82   :  { %v49_v12 = vpop.f32.mrf.mxu0 }
  0x83   :  { %v50_v13 = vadd.f32 %v201_v11, %v49_v12 }
  0x85   :  { %v53_v14 = vmax.f32 %v50_v13, 0.0 }
  0x87   :  { %v54_v15 = vpack.c.bf16 %v53_v14, %v53_v14 }
  0x89   :  { %131 = vmatmul.bf16.vlgmr.msra.gmra.mxu1 %v54_v15 }
  0x8a   :  { %v51_v16 = vpop.f32.mrf.mxu0 }
 0x106   :  { %v132_v18 = vpop.f32.mrf.mxu1 }
 0x107   :  { %v133_v19 = vadd.f32 %v202_v17, %v132_v18 }
 0x109   :  { %137 = vst.msk [vmem:[#allocation2] sm:$0x3] %vm136_vm1, %v133_v19 }
 0x10a   :  { %148 = dma.vmem_to_hbm [thread:$0]  %s144_s16, 32, %s146_s3, [#allocation3]  }
 0x10e   :  { %v134_v20 = vpop.f32.mrf.mxu1 }
 0x10f   :  { %227 = dma.done.wait [#allocation3], 32  }
 0x110   :  { %228 = vsyncadd [#allocation3], 4294967264 }
 0x111   :  { %153 = vsyncpa [#allocation3], 1 }

</bundles_post_ra>
